<compile_context>
chip_gen: v6e
topology: v6e:2x2x1
jax: 0.10.0
libtpu: 0.0.40
codegen_flags: <defaults>
</compile_context>

<pallas_src>
import functools

import jax
import jax.numpy as jnp
from jax.experimental import pallas as pl
from jax.experimental.pallas import tpu as pltpu


def _sparse_proj_kernel(z_ref, o_ref, *, lmbd):
    """One batch tile. Layout (N, TB): fields on sublanes, batch on lanes."""
    z = z_ref[...].astype(jnp.float32)
    N, TB = z.shape

    # z_s[:, 0] of the descending sort == per-column max.
    z = z - jnp.max(z, axis=0, keepdims=True)

    # "j strictly precedes i" in a stable descending sort (value desc, index
    # asc tie-break).  The lane-invariant (N, N, 1) triangle mask replaces the
    # old (N, N, TB) int32 iotas + int compare.
    zi = z[:, None, :]                                    # (N, 1, TB)
    zj = z[None, :, :]                                    # (1, N, TB)
    tri = (jax.lax.broadcasted_iota(jnp.int32, (N, N, 1), 1)
           < jax.lax.broadcasted_iota(jnp.int32, (N, N, 1), 0))
    beats = (zj > zi) | ((zj >= zi) & tri)                # (N, N, TB) bool

    # Same mask drives both sublane reductions, all in f32 (no int casts):
    #   rank_i = #{j preceding i}   (0-based sorted position of element i)
    #   csum_i = prefix sum of the sorted values through slot rank_i
    rank = jnp.sum(jnp.where(beats, 1.0, 0.0), axis=1)               # (N, TB)
    csum = jnp.sum(jnp.where(beats, zj, 0.0), axis=1) + z            # (N, TB)

    # Exact divide kept on purpose (only O(N*TB) work): approx reciprocal
    # would perturb taus feeding the strict `z > taus` compare at ties.
    taus = (csum - lmbd) / (rank + 1.0)                              # (N, TB)

    # Support size k (>= 1 for lmbd > 0) and tau = taus at sorted slot k-1.
    k = jnp.sum(jnp.where(z > taus, 1.0, 0.0), axis=0, keepdims=True)  # (1,TB)
    sel = rank == (k - 1.0)                                            # (N,TB)
    tau = jnp.sum(jnp.where(sel, taus, 0.0), axis=0, keepdims=True)    # (1,TB)
    # TODO(synk): for lmbd <= 0 PyTorch's gather(k-1) errors; here k == 0 would
    # silently yield tau = 0.  The module's lmbd > 0 precondition is kept.

    o_ref[...] = jnp.maximum(z - tau, 0.0).astype(o_ref.dtype)


def _vmem_capacity_bytes():
    try:
        v = int(pltpu.get_tpu_info().vmem_capacity_bytes)
    except Exception:
        v = 64 * 1024 * 1024  # conservative (v7x-sized) fallback
    return max(32 * 1024 * 1024, min(v, 128 * 1024 * 1024))


def _round_up(x, m):
    return ((x + m - 1) // m) * m


def _pick_batch_tile(B, N, vmem_bytes):
    """Largest 128-multiple batch tile whose O(N^2*TB) temps fit the budget."""
    budget = int(0.40 * vmem_bytes)        # ~40% of per-core VMEM for temps
    live_temps = 5                         # beats mask + 2 where-products + slack
    tb = budget // max(1, live_temps * N * N * 4)
    tb = max(128, min(4096, (tb // 128) * 128))
    # v7x-class parts (64 MiB VMEM per TC, 2 TCs/chip): keep >= 2 grid steps
    # so the "parallel" batch axis shards work across both TensorCores.
    if vmem_bytes <= 64 * 1024 * 1024 and B > 128:
        tb = min(tb, max(128, _round_up((B + 1) // 2, 128)))
    return min(tb, _round_up(B, 128))


def sparse_proj_cols(zt, lmbd=1.0):
    """Column layout: zt is (num_fields, batch); returns the same layout.

    Preferred entry point when neighbouring ops can produce/consume (N, B):
    it avoids the two standalone HBM transposes of the (B, N) wrapper.
    """
    N, B = zt.shape
    vmem = _vmem_capacity_bytes()
    tb = _pick_batch_tile(B, N, vmem)
    grid = (pl.cdiv(B, tb),)

    return pl.pallas_call(
        functools.partial(_sparse_proj_kernel, lmbd=float(lmbd)),
        out_shape=jax.ShapeDtypeStruct((N, B), zt.dtype),
        grid=grid,
        in_specs=[pl.BlockSpec((N, tb), lambda i: (0, i))],
        out_specs=pl.BlockSpec((N, tb), lambda i: (0, i)),
        compiler_params=pltpu.CompilerParams(
            dimension_semantics=("parallel",),        # megacore on 2-TC parts
            vmem_limit_bytes=int(0.8 * vmem),
        ),
    )(zt)


def sparse_proj(z, lmbd=1.0):
    """Module-compatible API: z is (batch, num_fields), output same shape/dtype."""
    # Native dtype straight through (no f32 materialization in the wrapper).
    # TODO(synk): an in-kernel (tb, N)<->(N, tb) transpose would also remove
    # these two XLA-level layout changes, but a padded minor-dim transpose is
    # not reliably lowered by Mosaic; callers that can should use
    # sparse_proj_cols to skip them entirely.
    return jnp.transpose(sparse_proj_cols(jnp.transpose(z), lmbd=lmbd))


def sparse_proj_ref(z, lmbd=1.0):
    """Pure-JAX reference mirroring the PyTorch forward exactly."""
    z_s = jnp.sort(z, axis=1)[:, ::-1]
    z = z - z_s[:, :1]
    z_s = z_s - z_s[:, :1]
    z_cumsum = jnp.cumsum(z_s, axis=1)
    id_range = jnp.arange(1, z.shape[1] + 1, dtype=z.dtype)
    taus = (z_cumsum - lmbd) / id_range
    k = jnp.sum(z_s > taus, axis=1, keepdims=True)
    tau = jnp.take_along_axis(taus, k - 1, axis=1)
    return jax.nn.relu(z - tau)


if __name__ == "__main__":
    batch, num_fields = 8, 16
    lmbd = 1.0

    key = jax.random.PRNGKey(0)
    z = jax.random.normal(key, (batch, num_fields), dtype=jnp.float32) * 2.0

    out = jax.block_until_ready(sparse_proj(z, lmbd=lmbd))
    ref = sparse_proj_ref(z, lmbd=lmbd)

    assert out.shape == (batch, num_fields)
    assert out.dtype == z.dtype
    assert jnp.allclose(out, ref, atol=1e-5, rtol=1e-5), (out, ref)

    print("KERNEL_OK")
</pallas_src>

<mosaic_0001>
module attributes {stable_mosaic.version = 11 : i64} {
  func.func @_sparse_proj_kernel(%arg0: i32, %arg1: memref<16x128xf32, #tpu.memory_space<vmem>>, %arg2: memref<16x128xf32, #tpu.memory_space<vmem>>) attributes {dimension_semantics = [#tpu.dimension_semantics<parallel>], iteration_bounds = array<i64: 1>, scalar_prefetch = 0 : i64, scratch_operands = 0 : i64, tpu.core_type = #tpu.core_type<tc>, window_params = [{transform_indices = @transform_0, window_bounds = array<i64: 16, 128>}, {transform_indices = @transform_1, window_bounds = array<i64: 16, 128>}]} {
    %c0 = arith.constant 0 : index
    %c0_0 = arith.constant 0 : index
    %0 = vector.load %arg1[%c0, %c0_0] : memref<16x128xf32, #tpu.memory_space<vmem>>, vector<16x128xf32>
    %cst = arith.constant dense<0xFF800000> : vector<128xf32>
    %1 = vector.multi_reduction <maximumf>, %0, %cst [0] : vector<16x128xf32> to vector<128xf32>
    %2 = vector.shape_cast %1 : vector<128xf32> to vector<1x128xf32>
    %3 = vector.broadcast %2 : vector<1x128xf32> to vector<16x128xf32>
    %4 = arith.subf %0, %3 : vector<16x128xf32>
    %5 = vector.shape_cast %4 : vector<16x128xf32> to vector<16x1x128xf32>
    %6 = vector.shape_cast %4 : vector<16x128xf32> to vector<1x16x128xf32>
    %7 = tpu.iota {dimensions = array<i32: 1>} : vector<16x16x1xi32>
    %8 = tpu.iota {dimensions = array<i32: 0>} : vector<16x16x1xi32>
    %9 = arith.cmpi slt, %7, %8 : vector<16x16x1xi32>
    %10 = vector.broadcast %6 : vector<1x16x128xf32> to vector<16x16x128xf32>
    %11 = vector.broadcast %5 : vector<16x1x128xf32> to vector<16x16x128xf32>
    %12 = arith.cmpf ogt, %10, %11 : vector<16x16x128xf32>
    %13 = vector.broadcast %6 : vector<1x16x128xf32> to vector<16x16x128xf32>
    %14 = vector.broadcast %5 : vector<16x1x128xf32> to vector<16x16x128xf32>
    %15 = arith.cmpf oge, %13, %14 : vector<16x16x128xf32>
    %16 = vector.broadcast %9 : vector<16x16x1xi1> to vector<16x16x128xi1>
    %17 = arith.andi %15, %16 : vector<16x16x128xi1>
    %18 = arith.ori %12, %17 : vector<16x16x128xi1>
    %cst_1 = arith.constant 1.000000e+00 : f32
    %cst_2 = arith.constant 0.000000e+00 : f32
    %19 = vector.broadcast %cst_1 : f32 to vector<16x16x128xf32>
    %20 = vector.broadcast %cst_2 : f32 to vector<16x16x128xf32>
    %21 = arith.select %18, %19, %20 : vector<16x16x128xi1>, vector<16x16x128xf32>
    %cst_3 = arith.constant dense<0.000000e+00> : vector<16x128xf32>
    %22 = vector.multi_reduction <add>, %21, %cst_3 [1] : vector<16x16x128xf32> to vector<16x128xf32>
    %cst_4 = arith.constant 0.000000e+00 : f32
    %23 = vector.shape_cast %6 : vector<1x16x128xf32> to vector<1x16x128xf32>
    %24 = vector.broadcast %23 : vector<1x16x128xf32> to vector<16x16x128xf32>
    %25 = vector.broadcast %cst_4 : f32 to vector<16x16x128xf32>
    %26 = arith.select %18, %24, %25 : vector<16x16x128xi1>, vector<16x16x128xf32>
    %cst_5 = arith.constant dense<0.000000e+00> : vector<16x128xf32>
    %27 = vector.multi_reduction <add>, %26, %cst_5 [1] : vector<16x16x128xf32> to vector<16x128xf32>
    %28 = arith.addf %27, %4 : vector<16x128xf32>
    %cst_6 = arith.constant 1.000000e+00 : f32
    %29 = vector.broadcast %cst_6 : f32 to vector<16x128xf32>
    %30 = arith.subf %28, %29 : vector<16x128xf32>
    %cst_7 = arith.constant 1.000000e+00 : f32
    %31 = vector.broadcast %cst_7 : f32 to vector<16x128xf32>
    %32 = arith.addf %22, %31 : vector<16x128xf32>
    %33 = arith.divf %30, %32 : vector<16x128xf32>
    %34 = arith.cmpf ogt, %4, %33 : vector<16x128xf32>
    %cst_8 = arith.constant 1.000000e+00 : f32
    %cst_9 = arith.constant 0.000000e+00 : f32
    %35 = vector.broadcast %cst_8 : f32 to vector<16x128xf32>
    %36 = vector.broadcast %cst_9 : f32 to vector<16x128xf32>
    %37 = arith.select %34, %35, %36 : vector<16x128xi1>, vector<16x128xf32>
    %cst_10 = arith.constant dense<0.000000e+00> : vector<128xf32>
    %38 = vector.multi_reduction <add>, %37, %cst_10 [0] : vector<16x128xf32> to vector<128xf32>
    %39 = vector.shape_cast %38 : vector<128xf32> to vector<1x128xf32>
    %cst_11 = arith.constant 1.000000e+00 : f32
    %40 = vector.broadcast %cst_11 : f32 to vector<1x128xf32>
    %41 = arith.subf %39, %40 : vector<1x128xf32>
    %42 = vector.broadcast %41 : vector<1x128xf32> to vector<16x128xf32>
    %43 = arith.cmpf oeq, %22, %42 : vector<16x128xf32>
    %cst_12 = arith.constant 0.000000e+00 : f32
    %44 = vector.broadcast %cst_12 : f32 to vector<16x128xf32>
    %45 = arith.select %43, %33, %44 : vector<16x128xi1>, vector<16x128xf32>
    %cst_13 = arith.constant dense<0.000000e+00> : vector<128xf32>
    %46 = vector.multi_reduction <add>, %45, %cst_13 [0] : vector<16x128xf32> to vector<128xf32>
    %47 = vector.shape_cast %46 : vector<128xf32> to vector<1x128xf32>
    %48 = vector.broadcast %47 : vector<1x128xf32> to vector<16x128xf32>
    %49 = arith.subf %4, %48 : vector<16x128xf32>
    %cst_14 = arith.constant 0.000000e+00 : f32
    %50 = vector.broadcast %cst_14 : f32 to vector<16x128xf32>
    %51 = arith.maximumf %49, %50 : vector<16x128xf32>
    %c0_15 = arith.constant 0 : index
    %c0_16 = arith.constant 0 : index
    %52 = vector.load %arg2[%c0_15, %c0_16] : memref<16x128xf32, #tpu.memory_space<vmem>>, vector<16x128xf32>
    tpu.vector_store %arg2[%c0_15, %c0_16], %51 {strides = array<i32>} : memref<16x128xf32, #tpu.memory_space<vmem>>, vector<16x128xf32>,
    return
  }
  func.func @transform_0(%arg0: i32) -> (i32, i32) {
    %c0_i32 = arith.constant 0 : i32
    %c0_i32_0 = arith.constant 0 : i32
    return %c0_i32, %arg0 : i32, i32
  }
  func.func @transform_1(%arg0: i32) -> (i32, i32) {
    %c0_i32 = arith.constant 0 : i32
    %c0_i32_0 = arith.constant 0 : i32
    return %c0_i32, %arg0 : i32, i32
  }
}

</mosaic_0001>

<bundles_post_ra>
// kernel: tpu_custom_call.1
= control target key start
LH: loop header
LB: loop body
LE: loop exit
PB: predicated region body
PF: predicated region fallthrough
CT: control target
= control target key end

     0   :  { %v1039_v8 = vmov 1966171168   ;;  %v25_v10 = vlaneseq  ;;  %s2052_s0 = inlined_call_operand.vmem [shape: f32[16,8], index: 0, kind: input, shape index: {}]   ;;  %s2053_s1 = inlined_call_operand.vmem [shape: f32[16,8], index: 1, kind: output, shape index: {}]  }
   0x1   :  { %v8_v0 = vld [vmem:[%s2052_s0] sm:$0xff]  ;;  %v9_v1 = vld [vmem:[%s2052_s0 + $0x8] sm:$0xff]  ;;  %v23_v9 = vunpack.c.l.s4 %v1039_v8 }
   0x2   :  { %v10_v2 = vmax.f32 %v8_v0, %v9_v1  ;;  %v1057_v13 = vshrl.u32 %v25_v10, 7  ;;  %v2188_v10 = vmov 0 }
   0x3   :  { %v24_v12 = vunpack.c.0.s8 %v23_v9 }
   0x4   :  { %v11_v3 = vrot.slane %v10_v2, 4  ;;  %v1071_v28 = vsub.s32 0, %v1057_v13  ;;  %v1074_v34 = vadd.s32 8, %v1057_v13  ;;  %vm124_vm0 = vcmp.lt.s32.totalorder %v1057_v13, 1 }
   0x5   :  { %v27_v15 = vsub.s32 %v24_v12, %v1057_v13  ;;  %vm126_vm1 = vcmp.lt.s32.totalorder %v1057_v13, 2  ;;  %vm128_vm2 = vcmp.lt.s32.totalorder %v1057_v13, 3  ;;  %vm130_vm3 = vcmp.lt.s32.totalorder %v1057_v13, 4 }
   0x6   :  { %v12_v4 = vmax.f32 %v10_v2, %v11_v3  ;;  %2096 = vst [vmem:[#allocation3_spill] sm:$0xff] %v1071_v28  ;;  %vm132_vm4 = vcmp.lt.s32.totalorder %v1057_v13, 5  ;;  %vm134_vm5 = vcmp.lt.s32.totalorder %v1057_v13, 6  ;;  %vm136_vm6 = vcmp.lt.s32.totalorder %v1057_v13, 7 }
   0x7   :  { %v2079_v3 = vmov 0.0  }
   0x8   :  { %v13_v5 = vrot.slane %v12_v4, 2 }
   0xa   :  { %v14_v6 = vmax.f32 %v12_v4, %v13_v5 }
   0xc   :  { %v15_v7 = vrot.slane %v14_v6, 1 }
   0xe   :  { %v16_v11 = vmax.f32 %v14_v6, %v15_v7 }
  0x10   :  { %v1059_v14 = vsub.f32 %v8_v0, %v16_v11  ;;  %v1065_v18 = vsub.f32 %v9_v1, %v16_v11 }
  0x12   :  { %v21_v16 = vcombine.high %v1059_v14, %v1059_v14  ;;  %v28_v17 = vrot.slane %v1059_v14, %v27_v15  ;;  %2095 = vst [vmem:[#allocation2_spill] sm:$0xff] %v1065_v18  ;;  %v70_v19 = vcombine.high %v1065_v18, %v1065_v18  ;;  %v77_v22 = vrot.slane %v1065_v18, %v27_v15 }
  0x14   :  { %v35_v20 = vrot.slane %v21_v16, %v27_v15  ;;  %v36_v21 = vcombine.high %v28_v17, %v28_v17  ;;  %v44_v23 = vrot.slane %v28_v17, %v27_v15  ;;  %v84_v24 = vrot.slane %v70_v19, %v27_v15 }
  0x15   :  { %v85_v27 = vcombine.high %v77_v22, %v77_v22  ;;  %v93_v35 = vrot.slane %v77_v22, %v27_v15  ;;  %v2122_v19 = vmov 0  ;;  %v2129_v22 = vmov 0 }
  0x16   :  { %v37_v25 = vcombine.high %v35_v20, %v35_v20  ;;  %v58_v26 = vrot.slane %v36_v21, %v27_v15  ;;  %v51_v29 = vrot.slane %v35_v20, %v27_v15  ;;  %v66_v30 = vcombine.high %v44_v23, %v44_v23 }
  0x17   :  { %v86_v31 = vcombine.high %v84_v24, %v84_v24  ;;  %v107_v36 = vrot.slane %v85_v27, %v27_v15  ;;  %v100_v39 = vrot.slane %v84_v24, %v27_v15  ;;  %v1090_v43 = vrot.slane %v44_v23, %v1071_v28 }
  0x18   :  { %v65_v32 = vrot.slane %v37_v25, %v27_v15  ;;  %v68_v33 = vcombine.high %v58_v26, %v58_v26  ;;  %v1082_v37 = vrot.slane %v58_v26, %v1071_v28  ;;  %v67_v38 = vcombine.high %v51_v29, %v51_v29 }
  0x19   :  { %v114_v40 = vrot.slane %v86_v31, %v27_v15  ;;  %v1086_v41 = vrot.slane %v66_v30, %v1071_v28  ;;  %v1098_v46 = vrot.slane %v51_v29, %v1071_v28  ;;  %v115_v50 = vcombine.high %v93_v35, %v93_v35 }
  0x1a   :  { %v69_v42 = vcombine.high %v65_v32, %v65_v32  ;;  %v1093_v44 = vrot.slane %v68_v33, %v1071_v28  ;;  %v117_v51 = vcombine.high %v107_v36, %v107_v36  ;;  %v1105_v52 = vrot.slane %v65_v32, %v1071_v28 }
  0x1b   :  { %vm268_vm9 = vcmp.ge.f32.partialorder %v1059_v14, %v1082_v37  ;;  %v116_v53 = vcombine.high %v100_v39, %v100_v39  ;;  %v118_v54 = vcombine.high %v114_v40, %v114_v40  ;;  %v1110_v55 = vrot.slane %v67_v38, %v1071_v28 }
  0x1c   :  { %vm270_vm10 = vcmp.ge.f32.partialorder %v1059_v14, %v1086_v41  ;;  %v1116_v56 = vrot.slane %v69_v42, %v1071_v28  ;;  %vm2055_vm12 = vcmp.gt.f32.partialorder %v1059_v14, %v1090_v43  ;;  %vm2054_vm13 = vcmp.gt.f32.partialorder %v1065_v18, %v1090_v43  ;;  %vm1131_vm11 = vmand %vm268_vm9, %vm124_vm0 }
  0x1d   :  { %vm272_vm14 = vcmp.ge.f32.partialorder %v1059_v14, %v1093_v44  ;;  %v1125_v57 = vrot.slane %v107_v36, %v1071_v28  ;;  %vm274_vm15 = vcmp.ge.f32.partialorder %v1059_v14, %v1098_v46  ;;  %v1139_v61 = vrot.slane %v93_v35, %v1071_v28  ;;  %vm1154_vm9 = vmand %vm270_vm10, %vm126_vm1 }
  0x1e   :  { %v1142_v62 = vrot.slane %v115_v50, %v1071_v28  ;;  %v1145_v63 = vrot.slane %v117_v51, %v1071_v28  ;;  %vm276_vm0 = vcmp.ge.f32.partialorder %v1059_v14, %v1105_v52  ;;  %v1159_v1 = vrot.slane %v100_v39, %v1071_v28  ;;  %vm1165_vm7 = vmand %vm272_vm14, %vm128_vm2 }
  0x1f   :  { %vm278_vm8 = vcmp.ge.f32.partialorder %v1059_v14, %v1110_v55  ;;  %v426_v4 = vsel %vm2055_vm12, 1.0, %v2079_v3  ;;  %v427_v5 = vsel %vm2054_vm13, 1.0, %v2079_v3  ;;  %v1178_v6 = vrot.slane %v114_v40, %v1071_v28  ;;  %vm1193_vm2 = vmand %vm274_vm15, %vm130_vm3 }
  0x20   :  { %v1181_v7 = vrot.slane %v116_v53, %v1071_v28  ;;  %v1184_v8 = vrot.slane %v118_v54, %v1071_v28  ;;  %vm285_vm1 = vcmp.ge.f32.partialorder %v1065_v18, %v1125_v57  ;;  %vm1211_vm3 = vmand %vm276_vm0, %vm132_vm4  ;;  %vm287_vm13 = vcmp.ge.f32.partialorder %v1065_v18, %v1142_v62 }
  0x21   :  { %vm1226_vm12 = vmand %vm278_vm8, %vm134_vm5  ;;  %v458_v12 = vadd.f32 %v427_v5, %v426_v4  ;;  %vm2109_vm5 = vcmp.ge.f32.partialorder %v1059_v14, %v1116_v56  ;;  %vm2112_vm14 = vcmp.lt.s32.totalorder %v1074_v34, 9  ;;  %vm2115_vm10 = vcmp.lt.s32.totalorder %v1074_v34, 10 }
  0x22   :  { %vm1243_vm8 = vmand %vm2109_vm5, %vm136_vm6  ;;  %vm2124_vm15 = vcmp.lt.s32.totalorder %v1074_v34, 11  ;;  %vm2125_vm0 = vcmp.ge.f32.partialorder %v1065_v18, %v1145_v63  ;;  %v2126_v21 = vmov 0  ;;  %v2134_v25 = vmov 0 }
  0x23   :  { %vm1260_vm6 = vmand %vm285_vm1, %vm2112_vm14  ;;  %vm2118_vm14 = vcmp.gt.f32.partialorder %v1059_v14, %v1082_v37  ;;  %v459_v20 = vrot.slane %v458_v12, 4  ;;  %v2141_v27 = vmov 0  ;;  %v2144_v29 = vmov 0 }
  0x24   :  { %vm1277_vm1 = vmand %vm287_vm13, %vm2115_vm10  ;;  %vm2121_vm10 = vcmp.gt.f32.partialorder %v1059_v14, %v1086_v41  ;;  %v2147_v32 = vmov 0  ;;  %v2155_v39 = vmov 0  ;;  %v2223_v5 = vmov 0 }
  0x25   :  { %vm1286_vm4 = vmor %vm2118_vm14, %vm1131_vm11  ;;  %vm2131_vm14 = vcmp.gt.f32.partialorder %v1059_v14, %v1090_v43  ;;  %v460_v30 = vadd.f32 %v459_v20, %v458_v12 }
  0x26   :  { %vm1301_vm5 = vmor %vm2121_vm10, %vm1154_vm9  ;;  %vm2128_vm9 = vcmp.gt.f32.partialorder %v1059_v14, %v1093_v44  ;;  %v570_v23 = vsel %vm2131_vm14, %v1059_v14, 0.0  ;;  %vm2133_vm14 = vcmp.gt.f32.partialorder %v1059_v14, %v1098_v46 }
  0x27   :  { %v2123_v19 = vsel %vm1301_vm5, 4294967295, %v2122_v19  ;;  %vm1314_vm13 = vmand %vm2125_vm0, %vm2124_vm15  ;;  %vm2132_vm15 = vcmp.gt.f32.partialorder %v1065_v18, %v1090_v43 }
  0x28   :  { %v2127_v21 = vsel %vm1314_vm13, 4294967295, %v2126_v21  ;;  %vm1323_vm10 = vmor %vm2128_vm9, %vm1165_vm7  ;;  %v571_v24 = vsel %vm2132_vm15, %v1065_v18, 0.0  ;;  %vm2140_vm15 = vcmp.gt.f32.partialorder %v1059_v14, %v1105_v52 }
  0x29   :  { %v2130_v22 = vsel %vm1323_vm10, 4294967295, %v2129_v22  ;;  %vm1348_vm13 = vmor %vm2133_vm14, %vm1193_vm2  ;;  %vm2136_vm2 = vcmp.lt.s32.totalorder %v1074_v34, 12  ;;  %vm2137_vm14 = vcmp.ge.f32.partialorder %v1065_v18, %v1159_v1  ;;  %v602_v31 = vadd.f32 %v571_v24, %v570_v23 }
  0x2a   :  { %v2135_v25 = vsel %vm1348_vm13, 4294967295, %v2134_v25  ;;  %vm1367_vm13 = vmand %vm2137_vm14, %vm2136_vm2  ;;  %vm2143_vm14 = vcmp.gt.f32.partialorder %v1059_v14, %v1110_v55  ;;  %vm2146_vm2 = vcmp.gt.f32.partialorder %v1059_v14, %v1116_v56  ;;  %v432_v15 = vsel %vm1323_vm10, 1.0, %v2079_v3 }
  0x2b   :  { %vm1376_vm7 = vmor %vm2140_vm15, %vm1211_vm3  ;;  %vm2151_vm3 = vcmp.gt.f32.partialorder %v1065_v18, %v1093_v44  ;;  %vm2154_vm15 = vcmp.ge.f32.partialorder %v1065_v18, %v1178_v6  ;;  %v603_v4 = vrot.slane %v602_v31, 4  ;;  %v2199_v23 = vmov 0 }
  0x2c   :  { %v2142_v27 = vsel %vm1376_vm7, 4294967295, %v2141_v27  ;;  %vm1390_vm9 = vmor %vm2143_vm14, %vm1226_vm12  ;;  %vm2149_vm12 = vcmp.gt.f32.partialorder %v1065_v18, %v1082_v37  ;;  %vm2150_vm14 = vcmp.gt.f32.partialorder %v1065_v18, %v1086_v41  ;;  %v433_v36 = vsel %vm2151_vm3, 1.0, %v2079_v3 }
  0x2d   :  { %v2145_v29 = vsel %vm1390_vm9, 4294967295, %v2144_v29  ;;  %vm1403_vm0 = vmor %vm2146_vm2, %vm1243_vm8  ;;  %v429_v33 = vsel %vm2149_vm12, 1.0, %v2079_v3  ;;  %v431_v35 = vsel %vm2150_vm14, 1.0, %v2079_v3  ;;  %vm2152_vm8 = vcmp.gt.f32.partialorder %v1065_v18, %v1098_v46 }
  0x2e   :  { %v2148_v32 = vsel %vm1403_vm0, 4294967295, %v2147_v32  ;;  %v435_v38 = vsel %vm2152_vm8, 1.0, %v2079_v3  ;;  %vm2153_vm12 = vcmp.lt.s32.totalorder %v1074_v34, 13  ;;  %vm2157_vm3 = vcmp.ge.f32.partialorder %v1059_v14, %v1139_v61 }
  0x2f   :  { %vm1430_vm11 = vmand %vm2154_vm15, %vm2153_vm12  ;;  %vm2158_vm14 = vcmp.gt.f32.partialorder %v1059_v14, %v1139_v61  ;;  %vm2161_vm8 = vcmp.gt.f32.partialorder %v1065_v18, %v1105_v52  ;;  %vm2162_vm15 = vcmp.gt.f32.partialorder %v1065_v18, %v1110_v55  ;;  %vm2163_vm12 = vcmp.gt.f32.partialorder %v1065_v18, %v1116_v56 }
  0x30   :  { %v2156_v39 = vsel %vm1430_vm11, 4294967295, %v2155_v39  ;;  %vm1440_vm0 = vmor %vm2158_vm14, %vm2157_vm3  ;;  %v437_v42 = vsel %vm2161_vm8, 1.0, %v2079_v3  ;;  %v439_v43 = vsel %vm2162_vm15, 1.0, %v2079_v3  ;;  %v441_v50 = vsel %vm2163_vm12, 1.0, %v2079_v3 }
  0x31   :  { %vm2164_vm3 = vcmp.gt.f32.partialorder %v1065_v18, %v1139_v61  ;;  %vm2165_vm14 = vcmp.ge.f32.partialorder %v1059_v14, %v1125_v57  ;;  %vm2166_vm8 = vcmp.gt.f32.partialorder %v1059_v14, %v1125_v57  ;;  %vm2169_vm15 = vcmp.gt.f32.partialorder %v1065_v18, %v1082_v37 }
  0x32   :  { %v443_v51 = vsel %vm2164_vm3, 1.0, %v2079_v3  ;;  %vm1466_vm2 = vmor %vm2166_vm8, %vm2165_vm14  ;;  %v1474_v54 = vsel %vm2169_vm15, %v1065_v18, 0.0  ;;  %vm2170_vm12 = vcmp.gt.f32.partialorder %v1065_v18, %v1086_v41  ;;  %vm2171_vm3 = vcmp.gt.f32.partialorder %v1065_v18, %v1093_v44 }
  0x33   :  { %v1480_v58 = vsel %vm2170_vm12, %v1065_v18, 0.0  ;;  %v1486_v0 = vsel %vm2171_vm3, %v1065_v18, 0.0  ;;  %vm2172_vm14 = vcmp.gt.f32.partialorder %v1065_v18, %v1098_v46  ;;  %vm2173_vm12 = vcmp.gt.f32.partialorder %v1065_v18, %v1125_v57 }
  0x34   :  { %v1492_v2 = vsel %vm2172_vm14, %v1065_v18, 0.0  ;;  %vm1503_vm11 = vmor %vm2173_vm12, %vm1260_vm6  ;;  %v461_v41 = vrot.slane %v460_v30, 2  ;;  %vm2176_vm3 = vcmp.gt.f32.partialorder %v1065_v18, %v1105_v52  ;;  %vm2177_vm14 = vcmp.gt.f32.partialorder %v1065_v18, %v1110_v55 }
  0x35   :  { %v1511_v44 = vsel %vm2176_vm3, %v1065_v18, 0.0  ;;  %v1517_v46 = vsel %vm2177_vm14, %v1065_v18, 0.0  ;;  %vm2178_vm12 = vcmp.ge.f32.partialorder %v1059_v14, %v1142_v62  ;;  %vm2179_vm8 = vcmp.gt.f32.partialorder %v1059_v14, %v1142_v62 }
  0x36   :  { %vm1527_vm15 = vmor %vm2179_vm8, %vm2178_vm12  ;;  %v2180_v52 = vmov 0  ;;  %vm2183_vm3 = vcmp.gt.f32.partialorder %v1065_v18, %v1116_v56  ;;  %vm2185_vm14 = vcmp.gt.f32.partialorder %v1065_v18, %v1139_v61  ;;  %vm2187_vm8 = vcmp.gt.f32.partialorder %v1065_v18, %v1142_v62 }
  0x37   :  { %v2181_v52 = vsel %vm1527_vm15, 4294967295, %v2180_v52  ;;  %v1535_v55 = vsel %vm2183_vm3, %v1065_v18, 0.0  ;;  %v1541_v57 = vsel %vm2185_vm14, %v1065_v18, 0.0  ;;  %vm1550_vm12 = vmor %vm2187_vm8, %vm1277_vm1  ;;  %v428_v56 = vsel %vm1286_vm4, 1.0, %v2079_v3 }
  0x38   :  { %2182 = vst [vmem:[#allocation4_spill] sm:$0xff] %v2181_v52  ;;  %2184 = vst [vmem:[#allocation5_spill] sm:$0xff] %v1535_v55  ;;  %v2189_v10 = vsel %vm1550_vm12, 4294967295, %v2188_v10  ;;  %v430_v61 = vsel %vm1301_vm5, 1.0, %v2079_v3  ;;  %vm2191_vm3 = vcmp.ge.f32.partialorder %v1059_v14, %v1145_v63  ;;  %vm2192_vm1 = vcmp.gt.f32.partialorder %v1059_v14, %v1145_v63 }
  0x39   :  { %2186 = vst [vmem:[#allocation6_spill] sm:$0xff] %v1541_v57  ;;  %2190 = vst [vmem:[#allocation7_spill] sm:$0xff] %v2189_v10  ;;  %v2193_v62 = vmov 0  ;;  %vm2196_vm8 = vnez %v2135_v25  ;;  %vm2197_vm6 = vnez %v2127_v21  ;;  %v1589_v24 = vadd.f32 %v461_v41, %v460_v30 }
  0x3a   :  { %vm1568_vm14 = vmor %vm2192_vm1, %vm2191_vm3  ;;  %v434_v13 = vsel %vm2196_vm8, 1.0, %v2079_v3  ;;  %vm2198_vm3 = vcmp.gt.f32.partialorder %v1065_v18, %v1145_v63  ;;  %v1591_v12 = vadd.f32 %v603_v4, %v602_v31  ;;  %vm2202_vm8 = vcmp.ge.f32.partialorder %v1059_v14, %v1159_v1 }
  0x3b   :  { %v2194_v62 = vsel %vm1568_vm14, 4294967295, %v2193_v62  ;;  %vm1585_vm1 = vmor %vm2198_vm3, %vm2197_vm6  ;;  %vm2203_vm10 = vcmp.gt.f32.partialorder %v1059_v14, %v1159_v1  ;;  %v2204_v63 = vmov 0  ;;  %v436_v21 = vsel %vm1376_vm7, 1.0, %v2079_v3 }
  0x3c   :  { %2195 = vst [vmem:[#allocation8_spill] sm:$0xff] %v2194_v62  ;;  %v2200_v23 = vsel %vm1585_vm1, 4294967295, %v2199_v23  ;;  %vm1601_vm5 = vmor %vm2203_vm10, %vm2202_vm8  ;;  %v438_v30 = vsel %vm1390_vm9, 1.0, %v2079_v3  ;;  %v465_v31 = vadd.f32 %v429_v33, %v428_v56  ;;  %v472_v41 = vadd.f32 %v431_v35, %v430_v61 }
  0x3d   :  { %2201 = vst [vmem:[#allocation9_spill] sm:$0xff] %v2200_v23  ;;  %v2205_v63 = vsel %vm1601_vm5, 4294967295, %v2204_v63  ;;  %vm2207_vm6 = vcmp.gt.f32.partialorder %v1065_v18, %v1159_v1  ;;  %v2208_v4 = vmov 0  ;;  %vm2211_vm10 = vnez %v2148_v32 }
  0x3e   :  { %2206 = vst [vmem:[#allocation10_spill] sm:$0xff] %v2205_v63  ;;  %vm1616_vm3 = vmor %vm2207_vm6, %vm1367_vm13  ;;  %v440_v9 = vsel %vm2211_vm10, 1.0, %v2079_v3  ;;  %v442_v11 = vsel %vm1440_vm0, 1.0, %v2079_v3  ;;  %v479_v20 = vadd.f32 %v433_v36, %v432_v15  ;;  %v486_v33 = vadd.f32 %v435_v38, %v434_v13 }
  0x3f   :  { %v2209_v4 = vsel %vm1616_vm3, 4294967295, %v2208_v4  ;;  %vm2212_vm8 = vcmp.lt.s32.totalorder %v1074_v34, 14  ;;  %vm2213_vm9 = vcmp.ge.f32.partialorder %v1065_v18, %v1181_v7  ;;  %v444_v26 = vsel %vm1466_vm2, 1.0, %v2079_v3 }
  0x40   :  { %2210 = vst [vmem:[#allocation11_spill] sm:$0xff] %v2209_v4  ;;  %vm1631_vm7 = vmand %vm2213_vm9, %vm2212_vm8  ;;  %v445_v35 = vsel %vm1503_vm11, 1.0, %v2079_v3  ;;  %v446_v36 = vsel %vm1527_vm15, 1.0, %v2079_v3  ;;  %v447_v38 = vsel %vm1550_vm12, 1.0, %v2079_v3  ;;  %vm2216_vm13 = vcmp.ge.f32.partialorder %v1059_v14, %v1178_v6 }
  0x41   :  { %vm2217_vm9 = vcmp.gt.f32.partialorder %v1059_v14, %v1178_v6  ;;  %v2218_v56 = vmov 0  ;;  %v448_v61 = vsel %vm1568_vm14, 1.0, %v2079_v3  ;;  %v449_v15 = vsel %vm1585_vm1, 1.0, %v2079_v3 }
  0x42   :  { %vm1653_vm6 = vmor %vm2217_vm9, %vm2216_vm13  ;;  %v493_v13 = vadd.f32 %v437_v42, %v436_v21  ;;  %v500_v16 = vadd.f32 %v439_v43, %v438_v30  ;;  %vm2221_vm13 = vnez %v2156_v39  ;;  %vm2222_vm9 = vcmp.gt.f32.partialorder %v1065_v18, %v1178_v6 }
  0x43   :  { %v2219_v56 = vsel %vm1653_vm6, 4294967295, %v2218_v56  ;;  %vm1671_vm15 = vmor %vm2222_vm9, %vm2221_vm13  ;;  %v450_v60 = vsel %vm1601_vm5, 1.0, %v2079_v3  ;;  %v451_v42 = vsel %vm1616_vm3, 1.0, %v2079_v3  ;;  %v507_v43 = vadd.f32 %v441_v50, %v440_v9 }
  0x44   :  { %2220 = vst [vmem:[#allocation12_spill] sm:$0xff] %v2219_v56  ;;  %v2224_v5 = vsel %vm1671_vm15, 4294967295, %v2223_v5  ;;  %v514_v21 = vadd.f32 %v443_v51, %v442_v11  ;;  %v466_v30 = vrot.slane %v465_v31, 4  ;;  %v473_v59 = vrot.slane %v472_v41, 4 }
  0x45   :  { %2225 = vst [vmem:[#allocation13_spill] sm:$0xff] %v2224_v5  ;;  %v521_v39 = vadd.f32 %v445_v35, %v444_v26  ;;  %v528_v49 = vadd.f32 %v447_v38, %v446_v36  ;;  %vm2226_vm12 = vcmp.ge.f32.partialorder %v1059_v14, %v1181_v7  ;;  %vm2227_vm8 = vcmp.gt.f32.partialorder %v1059_v14, %v1181_v7 }
  0x46   :  { %vm1691_vm5 = vmor %vm2227_vm8, %vm2226_vm12  ;;  %v2228_v6 = vmov 0  ;;  %v480_v50 = vrot.slane %v479_v20, 4  ;;  %v487_v51 = vrot.slane %v486_v33, 4  ;;  %v535_v9 = vadd.f32 %v449_v15, %v448_v61 }
  0x47   :  { %v2229_v6 = vsel %vm1691_vm5, 4294967295, %v2228_v6  ;;  %vm2231_vm9 = vcmp.gt.f32.partialorder %v1065_v18, %v1181_v7  ;;  %v2232_v26 = vmov 0  ;;  %v452_v35 = vsel %vm1653_vm6, 1.0, %v2079_v3 }
  0x48   :  { %2230 = vst [vmem:[#allocation14_spill] sm:$0xff] %v2229_v6  ;;  %vm1705_vm3 = vmor %vm2231_vm9, %vm1631_vm7  ;;  %v453_v36 = vsel %vm1671_vm15, 1.0, %v2079_v3  ;;  %v494_v38 = vrot.slane %v493_v13, 4  ;;  %v542_v61 = vadd.f32 %v451_v42, %v450_v60  ;;  %v501_v15 = vrot.slane %v500_v16, 4 }
  0x49   :  { %v2233_v26 = vsel %vm1705_vm3, 4294967295, %v2232_v26  ;;  %v508_v48 = vrot.slane %v507_v43, 4  ;;  %v515_v1 = vrot.slane %v514_v21, 4  ;;  %vm2235_vm12 = vnez %v2123_v19 }
  0x4a   :  { %2234 = vst [vmem:[#allocation15_spill] sm:$0xff] %v2233_v26  ;;  %v467_v47 = vadd.f32 %v466_v30, %v465_v31  ;;  %v474_v45 = vadd.f32 %v473_v59, %v472_v41  ;;  %v522_v11 = vrot.slane %v521_v39, 4  ;;  %v529_v28 = vrot.slane %v528_v49, 4 }
  0x4b   :  { %v454_v56 = vsel %vm1691_vm5, 1.0, %v2079_v3  ;;  %v455_v5 = vsel %vm1705_vm3, 1.0, %v2079_v3  ;;  %v536_v60 = vrot.slane %v535_v9, 4  ;;  %v549_v42 = vadd.f32 %v453_v36, %v452_v35 }
  0x4c   :  { %v481_v4 = vadd.f32 %v480_v50, %v479_v20  ;;  %v488_v63 = vadd.f32 %v487_v51, %v486_v33  ;;  %v495_v23 = vadd.f32 %v494_v38, %v493_v13  ;;  %v543_v57 = vrot.slane %v542_v61, 4 }
  0x4d   :  { %v502_v62 = vadd.f32 %v501_v15, %v500_v16  ;;  %v509_v7 = vadd.f32 %v508_v48, %v507_v43  ;;  %v516_v31 = vadd.f32 %v515_v1, %v514_v21  ;;  %v463_v41 = vrot.slane %v1589_v24, 1 }
  0x4e   :  { %v523_v30 = vadd.f32 %v522_v11, %v521_v39  ;;  %v530_v6 = vadd.f32 %v529_v28, %v528_v49  ;;  %v556_v10 = vadd.f32 %v455_v5, %v454_v56  ;;  %v468_v55 = vrot.slane %v467_v47, 2 }
  0x4f   :  { %v475_v52 = vrot.slane %v474_v45, 2  ;;  %v537_v26 = vadd.f32 %v536_v60, %v535_v9  ;;  %v550_v3 = vrot.slane %v549_v42, 4  ;;  %vm2236_vm7 = vcmp.lt.s32.totalorder %v1074_v34, 15 }
  0x50   :  { %vm2237_vm8 = vcmp.ge.f32.partialorder %v1065_v18, %v1184_v8  ;;  %v482_v16 = vrot.slane %v481_v4, 2  ;;  %v489_v48 = vrot.slane %v488_v63, 2  ;;  %v496_v20 = vrot.slane %v495_v23, 2 }
  0x51   :  { %vm393_vm9 = vmand %vm2237_vm8, %vm2236_vm7  ;;  %v544_v33 = vadd.f32 %v543_v57, %v542_v61  ;;  %v503_v13 = vrot.slane %v502_v62, 2  ;;  %v510_v43 = vrot.slane %v509_v7, 2  ;;  %v517_v21 = vrot.slane %v516_v31, 2 }
  0x52   :  { %vm2238_vm13 = vnez %v2130_v22  ;;  %vm2239_vm3 = vcmp.ge.f32.partialorder %v1059_v14, %v1184_v8  ;;  %vm2240_vm5 = vcmp.gt.f32.partialorder %v1059_v14, %v1184_v8  ;;  %v524_v49 = vrot.slane %v523_v30, 2 }
  0x53   :  { %vm1740_vm15 = vmor %vm2240_vm5, %vm2239_vm3  ;;  %v531_v5 = vrot.slane %v530_v6, 2  ;;  %v557_v57 = vrot.slane %v556_v10, 4  ;;  %vm2243_vm7 = vnez %v2135_v25  ;;  %vm2244_vm8 = vcmp.gt.f32.partialorder %v1065_v18, %v1184_v8 }
  0x54   :  { %v578_v56 = vsel %vm2243_vm7, %v1059_v14, 0.0  ;;  %vm1750_vm6 = vmor %vm2244_vm8, %vm393_vm9  ;;  %v469_v50 = vadd.f32 %v468_v55, %v467_v47  ;;  %v476_v51 = vadd.f32 %v475_v52, %v474_v45  ;;  %v538_v9 = vrot.slane %v537_v26, 2 }
  0x55   :  { %v551_v11 = vadd.f32 %v550_v3, %v549_v42  ;;  %v483_v35 = vadd.f32 %v482_v16, %v481_v4  ;;  %v490_v36 = vadd.f32 %v489_v48, %v488_v63  ;;  %v497_v38 = vadd.f32 %v496_v20, %v495_v23 }
  0x56   :  { %v545_v61 = vrot.slane %v544_v33, 2  ;;  %v2247_v15 = vmov 0.0   ;;  %v504_v1 = vadd.f32 %v503_v13, %v502_v62  ;;  %v511_v60 = vadd.f32 %v510_v43, %v509_v7 }
  0x57   :  { %v456_v25 = vsel %vm1740_vm15, 1.0, %v2247_v15  ;;  %v518_v59 = vadd.f32 %v517_v21, %v516_v31  ;;  %v457_v8 = vsel %vm1750_vm6, 1.0, %v2247_v15  ;;  %v525_v28 = vadd.f32 %v524_v49, %v523_v30 }
  0x58   :  { %v532_v47 = vadd.f32 %v531_v5, %v530_v6  ;;  %v558_v45 = vadd.f32 %v557_v57, %v556_v10  ;;  %v470_v52 = vrot.slane %v469_v50, 1  ;;  %v477_v3 = vrot.slane %v476_v51, 1 }
  0x59   :  { %v539_v55 = vadd.f32 %v538_v9, %v537_v26  ;;  %v552_v63 = vrot.slane %v551_v11, 2  ;;  %v484_v23 = vrot.slane %v483_v35, 1  ;;  %v491_v4 = vrot.slane %v490_v36, 1 }
  0x5a   :  { %v498_v42 = vrot.slane %v497_v38, 1  ;;  %v546_v16 = vadd.f32 %v545_v61, %v544_v33  ;;  %v505_v48 = vrot.slane %v504_v1, 1  ;;  %v512_v20 = vrot.slane %v511_v60, 1 }
  0x5b   :  { %v519_v62 = vrot.slane %v518_v59, 1  ;;  %v563_v7 = vadd.f32 %v457_v8, %v456_v25  ;;  %v1761_v31 = vadd.f32 %v463_v41, %v1589_v24  ;;  %v526_v13 = vrot.slane %v525_v28, 1 }
  0x5c   :  { %v533_v43 = vrot.slane %v532_v47, 1  ;;  %v559_v30 = vrot.slane %v558_v45, 2  ;;  %v1763_v6 = vadd.f32 %v470_v52, %v469_v50  ;;  %v1765_v10 = vadd.f32 %v477_v3, %v476_v51  ;;  %v2253_v3 = vld [vmem:[#allocation4_spill] sm:$0xff] }
  0x5d   :  { %v540_v26 = vrot.slane %v539_v55, 1  ;;  %v553_v21 = vadd.f32 %v552_v63, %v551_v11  ;;  %v1767_v49 = vadd.f32 %v484_v23, %v483_v35  ;;  %v1769_v5 = vadd.f32 %v491_v4, %v490_v36  ;;  %v2259_v4 = vld [vmem:[#allocation6_spill] sm:$0xff]  ;;  %v2271_v63 = vld [vmem:[#allocation15_spill] sm:$0xff] }
  0x5e   :  { %v1771_v33 = vadd.f32 %v498_v42, %v497_v38  ;;  %v547_v57 = vrot.slane %v546_v16, 1  ;;  %v1773_v9 = vadd.f32 %v505_v48, %v504_v1  ;;  %v1775_v24 = vadd.f32 %v512_v20, %v511_v60 }
  0x5f   :  { %v1777_v41 = vadd.f32 %v519_v62, %v518_v59  ;;  %v564_v61 = vrot.slane %v563_v7, 4  ;;  %v1779_v50 = vadd.f32 %v526_v13, %v525_v28  ;;  %v1781_v51 = vadd.f32 %v533_v43, %v532_v47  ;;  %v2261_v43 = vld [vmem:[#allocation10_spill] sm:$0xff] }
  0x60   :  { %v560_v25 = vadd.f32 %v559_v30, %v558_v45  ;;  %vm2248_vm5 = vnez %v2142_v27  ;;  %v1786_v35 = vadd.f32 %v540_v26, %v539_v55  ;;  %v554_v36 = vrot.slane %v553_v21, 1  ;;  %v2256_v55 = vld [vmem:[#allocation7_spill] sm:$0xff] }
  0x61   :  { %v580_v11 = vsel %vm2248_vm5, %v1059_v14, 0.0  ;;  %vm2249_vm3 = vnez %v2145_v29  ;;  %v2250_v59 = vsel %vm1286_vm4, %v1059_v14, 0.0  ;;  %v1796_v1 = vadd.f32 %v547_v57, %v546_v16 }
  0x62   :  { %v582_v38 = vsel %vm2249_vm3, %v1059_v14, 0.0  ;;  %v609_v28 = vadd.f32 %v1474_v54, %v2250_v59  ;;  %v584_v27 = vsel %vm2211_vm10, %v1059_v14, 0.0  ;;  %v586_v60 = vsel %vm1440_vm0, %v1059_v14, 0.0 }
  0x63   :  { %v2251_v29 = vsel %vm2235_vm12, %v1059_v14, 0.0  ;;  %v565_v8 = vadd.f32 %v564_v61, %v563_v7  ;;  %v2252_v54 = vsel %vm2238_vm13, %v1059_v14, 0.0  ;;  %v630_v32 = vadd.f32 %v1492_v2, %v578_v56  ;;  %v2255_v56 = vld [vmem:[#allocation5_spill] sm:$0xff]  ;;  %v2265_v61 = vld [vmem:[#allocation12_spill] sm:$0xff] }
  0x64   :  { %v616_v17 = vadd.f32 %v1480_v58, %v2251_v29  ;;  %v623_v47 = vadd.f32 %v1486_v0, %v2252_v54  ;;  %v637_v45 = vadd.f32 %v1511_v44, %v580_v11  ;;  %v561_v52 = vrot.slane %v560_v25, 1 }
  0x65   :  { %v588_v19 = vsel %vm1466_vm2, %v1059_v14, 0.0  ;;  %v589_v40 = vsel %vm1503_vm11, %v1065_v18, 0.0  ;;  %v644_v58 = vadd.f32 %v1517_v46, %v582_v38  ;;  %v1823_v22 = vadd.f32 %v554_v36, %v553_v21  ;;  %v2263_v21 = vld [vmem:[#allocation11_spill] sm:$0xff]  ;;  %v2267_v38 = vld [vmem:[#allocation13_spill] sm:$0xff] }
  0x66   :  { %vm2254_vm4 = vnez %v2253_v3  ;;  %v610_v2 = vrot.slane %v609_v28, 4  ;;  %v651_v44 = vadd.f32 %v2255_v56, %v584_v27  ;;  %vm2257_vm0 = vnez %v2256_v55  ;;  %v2269_v27 = vld [vmem:[#allocation14_spill] sm:$0xff] }
  0x67   :  { %v590_v0 = vsel %vm2254_vm4, %v1059_v14, 0.0  ;;  %v591_v53 = vsel %vm2257_vm0, %v1065_v18, 0.0  ;;  %v592_v37 = vsel %vm1568_vm14, %v1059_v14, 0.0  ;;  %v617_v23 = vrot.slane %v616_v17, 4 }
  0x68   :  { %v658_v46 = vadd.f32 %v2259_v4, %v586_v60  ;;  %v566_v42 = vrot.slane %v565_v8, 2  ;;  %v624_v16 = vrot.slane %v623_v47, 4  ;;  %v631_v48 = vrot.slane %v630_v32, 4 }
  0x69   :  { %v638_v20 = vrot.slane %v637_v45, 4  ;;  %v1836_v62 = vadd.f32 %v561_v52, %v560_v25  ;;  %v593_v13 = vsel %vm1585_vm1, %v1065_v18, 0.0  ;;  %vm2262_vm11 = vnez %v2261_v43 }
  0x6a   :  { %v594_v30 = vsel %vm2262_vm11, %v1059_v14, 0.0  ;;  %v645_v26 = vrot.slane %v644_v58, 4  ;;  %vm2264_vm2 = vnez %v2263_v21  ;;  %vm2266_vm14 = vnez %v2265_v61 }
  0x6b   :  { %v595_v57 = vsel %vm2264_vm2, %v1065_v18, 0.0  ;;  %v596_v11 = vsel %vm2266_vm14, %v1059_v14, 0.0  ;;  %v611_v36 = vadd.f32 %v610_v2, %v609_v28  ;;  %v652_v25 = vrot.slane %v651_v44, 4 }
  0x6c   :  { %vm2268_vm10 = vnez %v2267_v38  ;;  %vm2270_vm1 = vnez %v2269_v27  ;;  %v618_v29 = vadd.f32 %v617_v23, %v616_v17  ;;  %v659_v54 = vrot.slane %v658_v46, 4 }
  0x6d   :  { %v597_v59 = vsel %vm2268_vm10, %v1065_v18, 0.0  ;;  %v598_v60 = vsel %vm2270_vm1, %v1059_v14, 0.0  ;;  %v567_v52 = vadd.f32 %v566_v42, %v565_v8  ;;  %v625_v3 = vadd.f32 %v624_v16, %v623_v47 }
  0x6e   :  { %v632_v56 = vadd.f32 %v631_v48, %v630_v32  ;;  %v639_v55 = vadd.f32 %v638_v20, %v637_v45  ;;  %vm2272_vm13 = vnez %v2271_v63  ;;  %v600_v28 = vsel %vm1740_vm15, %v1059_v14, 0.0 }
  0x6f   :  { %v599_v4 = vsel %vm2272_vm13, %v1065_v18, 0.0  ;;  %v601_v2 = vsel %vm1750_vm6, %v1065_v18, 0.0  ;;  %v646_v7 = vadd.f32 %v645_v26, %v644_v58  ;;  %v612_v43 = vrot.slane %v611_v36, 2 }
  0x70   :  { %v653_v17 = vadd.f32 %v652_v25, %v651_v44  ;;  %v665_v23 = vadd.f32 %v589_v40, %v588_v19  ;;  %v672_v8 = vadd.f32 %v591_v53, %v590_v0  ;;  %v2273_v47 = vrot.slane %v1591_v12, 2 }
  0x71   :  { %v619_v45 = vrot.slane %v618_v29, 2  ;;  %v660_v42 = vadd.f32 %v659_v54, %v658_v46  ;;  %v679_v16 = vadd.f32 %v593_v13, %v592_v37  ;;  %v626_v48 = vrot.slane %v625_v3, 2 }
  0x72   :  { %v606_v32 = vadd.f32 %v2273_v47, %v1591_v12  ;;  %v633_v20 = vrot.slane %v632_v56, 2  ;;  %v640_v34 = vrot.slane %v639_v55, 2  ;;  %v686_v21 = vadd.f32 %v595_v57, %v594_v30 }
  0x73   :  { %v568_v61 = vrot.slane %v567_v52, 1  ;;  %v647_v38 = vrot.slane %v646_v7, 2  ;;  %v693_v39 = vadd.f32 %v597_v59, %v596_v11  ;;  %v700_v27 = vadd.f32 %v599_v4, %v598_v60 }
  0x74   :  { %v613_v58 = vadd.f32 %v612_v43, %v611_v36  ;;  %v654_v26 = vrot.slane %v653_v17, 2  ;;  %v666_v44 = vrot.slane %v665_v23, 4  ;;  %v673_v19 = vrot.slane %v672_v8, 4 }
  0x75   :  { %v607_v40 = vrot.slane %v606_v32, 1  ;;  %v620_v0 = vadd.f32 %v619_v45, %v618_v29  ;;  %v661_v53 = vrot.slane %v660_v42, 2  ;;  %v680_v25 = vrot.slane %v679_v16, 4 }
  0x76   :  { %v627_v12 = vadd.f32 %v626_v48, %v625_v3  ;;  %v634_v63 = vadd.f32 %v633_v20, %v632_v56  ;;  %v641_v46 = vadd.f32 %v640_v34, %v639_v55  ;;  %v687_v37 = vrot.slane %v686_v21, 4 }
  0x77   :  { %v1868_v13 = vadd.f32 %v568_v61, %v567_v52  ;;  %v648_v54 = vadd.f32 %v647_v38, %v646_v7  ;;  %v694_v30 = vrot.slane %v693_v39, 4  ;;  %v701_v57 = vrot.slane %v700_v27, 4 }
  0x78   :  { %v614_v47 = vrot.slane %v613_v58, 1  ;;  %v655_v11 = vadd.f32 %v654_v26, %v653_v17  ;;  %v667_v59 = vadd.f32 %v666_v44, %v665_v23  ;;  %v674_v36 = vadd.f32 %v673_v19, %v672_v8 }
  0x79   :  { %v621_v60 = vrot.slane %v620_v0, 1  ;;  %v662_v4 = vadd.f32 %v661_v53, %v660_v42  ;;  %v681_v43 = vadd.f32 %v680_v25, %v679_v16  ;;  %v707_v15 = vadd.f32 %v601_v2, %v600_v28 }
  0x7a   :  { %v628_v29 = vrot.slane %v627_v12, 1  ;;  %v635_v45 = vrot.slane %v634_v63, 1  ;;  %v642_v18 = vrot.slane %v641_v46, 1  ;;  %v688_v3 = vadd.f32 %v687_v37, %v686_v21 }
  0x7b   :  { %v608_v56 = vadd.f32 %v607_v40, %v606_v32  ;;  %v649_v55 = vrot.slane %v648_v54, 1  ;;  %v695_v48 = vadd.f32 %v694_v30, %v693_v39  ;;  %v702_v52 = vadd.f32 %v701_v57, %v700_v27 }
  0x7c   :  { %v615_v20 = vadd.f32 %v614_v47, %v613_v58  ;;  %v656_v7 = vrot.slane %v655_v11, 1  ;;  %v668_v34 = vrot.slane %v667_v59, 2  ;;  %v675_v61 = vrot.slane %v674_v36, 2 }
  0x7d   :  { %v622_v38 = vadd.f32 %v621_v60, %v620_v0  ;;  %v663_v17 = vrot.slane %v662_v4, 1  ;;  %v682_v23 = vrot.slane %v681_v43, 2  ;;  %v708_v8 = vrot.slane %v707_v15, 4 }
  0x7e   :  { %v629_v26 = vadd.f32 %v628_v29, %v627_v12  ;;  %v636_v42 = vadd.f32 %v635_v45, %v634_v63  ;;  %v643_v16 = vadd.f32 %v642_v18, %v641_v46  ;;  %v689_v28 = vrot.slane %v688_v3, 2 }
  0x7f   :  { %v650_v2 = vadd.f32 %v649_v55, %v648_v54  ;;  %v696_v44 = vrot.slane %v695_v48, 2  ;;  %v703_v19 = vrot.slane %v702_v52, 2  ;;  %v776_v32 = vadd.f32 1.0, %v1761_v31 }
  0x80   :  { %v1871_v21 = vadd.f32 %v656_v7, %v655_v11  ;;  %v669_v39 = vadd.f32 %v668_v34, %v667_v59  ;;  %v676_v27 = vadd.f32 %v675_v61, %v674_v36  ;;  %v777_v58 = vadd.f32 1.0, %v1763_v6 }
  0x81   :  { %v664_v40 = vadd.f32 %v663_v17, %v662_v4  ;;  %v683_v0 = vadd.f32 %v682_v23, %v681_v43  ;;  %v709_v53 = vadd.f32 %v708_v8, %v707_v15  ;;  %v778_v25 = vadd.f32 1.0, %v1765_v10 }
  0x82   :  { %v690_v12 = vadd.f32 %v689_v28, %v688_v3  ;;  %v744_v18 = vadd.f32 %v608_v56, %v1059_v14  ;;  %v2274_v63 = vrot.slane %v1059_v14, 1  ;;  %v779_v37 = vadd.f32 1.0, %v1767_v49 }
  0x83   :  { %v697_v54 = vadd.f32 %v696_v44, %v695_v48  ;;  %v704_v30 = vadd.f32 %v703_v19, %v702_v52  ;;  %v780_v57 = vadd.f32 1.0, %v1769_v5  ;;  %1007 = vrcp.f32 %v776_v32 }
  0x84   :  { %v745_v46 = vadd.f32 %v2274_v63, %v615_v20  ;;  %v670_v47 = vrot.slane %v669_v39, 1  ;;  %v677_v11 = vrot.slane %v676_v27, 1  ;;  %v781_v59 = vadd.f32 1.0, %v1771_v33 }
  0x85   :  { %1009 = vrcp.f32 %v777_v58  ;;  %v684_v15 = vrot.slane %v683_v0, 1  ;;  %v710_v36 = vrot.slane %v709_v53, 2  ;;  %v782_v60 = vadd.f32 1.0, %v1773_v9 }
  0x86   :  { %1011 = vrcp.f32 %v778_v25  ;;  %v691_v4 = vrot.slane %v690_v12, 1  ;;  %v2275_v43 = vrot.slane %v1059_v14, 2  ;;  %v783_v45 = vadd.f32 1.0, %v1775_v24 }
  0x87   :  { %1013 = vrcp.f32 %v779_v37  ;;  %v698_v3 = vrot.slane %v697_v54, 1  ;;  %v705_v56 = vrot.slane %v704_v30, 1  ;;  %v784_v55 = vadd.f32 1.0, %v1777_v41 }
  0x88   :  { %v746_v29 = vadd.f32 %v2275_v43, %v622_v38  ;;  %1015 = vrcp.f32 %v780_v57  ;;  %v671_v48 = vadd.f32 %v670_v47, %v669_v39  ;;  %v678_v52 = vadd.f32 %v677_v11, %v676_v27 }
  0x89   :  { %v785_v20 = vadd.f32 1.0, %v1779_v50  ;;  %1017 = vrcp.f32 %v781_v59  ;;  %v685_v7 = vadd.f32 %v684_v15, %v683_v0  ;;  %v711_v34 = vadd.f32 %v710_v36, %v709_v53 }
  0x8a   :  { %v786_v61 = vadd.f32 1.0, %v1781_v51  ;;  %1019 = vrcp.f32 %v782_v60  ;;  %v692_v17 = vadd.f32 %v691_v4, %v690_v12  ;;  %v2276_v38 = vrot.slane %v1059_v14, 3 }
  0x8b   :  { %v787_v8 = vadd.f32 1.0, %v1786_v35  ;;  %1021 = vrcp.f32 %v783_v45  ;;  %v699_v28 = vadd.f32 %v698_v3, %v697_v54  ;;  %v706_v44 = vadd.f32 %v705_v56, %v704_v30  ;;  %v2281_v30 = vld [vmem:[#allocation2_spill] sm:$0xff] }
  0x8c   :  { %v747_v23 = vadd.f32 %v2276_v38, %v629_v26  ;;  %v788_v19 = vadd.f32 1.0, %v1796_v1  ;;  %1023 = vrcp.f32 %v784_v55  ;;  %vm2094_vm15 = vcmask 1041409  }
  0x8d   :  { %v2277_v32 = vrot.slane %v1059_v14, 4  ;;  %v2278_v27 = vrot.slane %v1059_v14, 5  ;;  %v789_v0 = vadd.f32 1.0, %v1823_v22  ;;  %1025 = vrcp.f32 %v785_v20 }
  0x8e   :  { %vm2093_vm6 = vcmask 1042434   ;;  %v712_v26 = vrot.slane %v711_v34, 1  ;;  %v2279_v53 = vrot.slane %v1059_v14, 6  ;;  %v790_v12 = vadd.f32 1.0, %v1836_v62 }
  0x8f   :  { %v748_v39 = vadd.f32 %v2277_v32, %v636_v42  ;;  %v749_v58 = vadd.f32 %v2278_v27, %v643_v16  ;;  %1027 = vrcp.f32 %v786_v61  ;;  %vm2092_vm12 = vcmask 1043459  }
  0x90   :  { %v750_v25 = vadd.f32 %v2279_v53, %v650_v2  ;;  %v988_v63 = vadd.f32 -1.0, %v744_v18  ;;  %v989_v37 = vadd.f32 -1.0, %v745_v46  ;;  %v791_v54 = vadd.f32 1.0, %v1868_v13  ;;  %v1008_v2 = vpop.eup %1007 }
  0x91   :  { %1029 = vrcp.f32 %v787_v8  ;;  %vm2091_vm9 = vcmask 1044484   ;;  %v2280_v42 = vrot.slane %v1059_v14, 7  ;;  %v752_v57 = vadd.f32 %v664_v40, %v2281_v30 }
  0x92   :  { %v990_v47 = vadd.f32 -1.0, %v746_v29  ;;  %1031 = vrcp.f32 %v788_v19  ;;  %vm2090_vm7 = vcmask 1045509   ;;  %v2282_v11 = vrot.slane %v2281_v30, 1  ;;  %v1010_v36 = vpop.eup %1009 }
  0x93   :  { %v751_v16 = vadd.f32 %v2280_v42, %v1871_v21  ;;  %v2283_v18 = vrot.slane %v2281_v30, 2  ;;  %v991_v15 = vadd.f32 -1.0, %v747_v23  ;;  %1033 = vrcp.f32 %v789_v0  ;;  %v1012_v40 = vpop.eup %1011 }
  0x94   :  { %v753_v59 = vadd.f32 %v2282_v11, %v671_v48  ;;  %vm2089_vm8 = vcmask 1046534   ;;  %v713_v60 = vadd.f32 %v712_v26, %v711_v34  ;;  %v2284_v4 = vrot.slane %v2281_v30, 3  ;;  %v1014_v56 = vpop.eup %1013 }
  0x95   :  { %v754_v46 = vadd.f32 %v2283_v18, %v678_v52  ;;  %v992_v43 = vadd.f32 -1.0, %v748_v39  ;;  %1035 = vrcp.f32 %v790_v12  ;;  %v993_v29 = vadd.f32 -1.0, %v749_v58 }
  0x96   :  { %v755_v21 = vadd.f32 %v2284_v4, %v685_v7  ;;  %v1911_v45 = vmul.f32 %v1008_v2, %v988_v63  ;;  %v1913_v3 = vmul.f32 %v1010_v36, %v989_v37  ;;  %1037 = vrcp.f32 %v791_v54  ;;  %v1016_v7 = vpop.eup %1015 }
  0x97   :  { %v2285_v55 = vrot.slane %v2281_v30, 4  ;;  %v2286_v52 = vrot.slane %v2281_v30, 5  ;;  %v994_v34 = vadd.f32 -1.0, %v750_v25  ;;  %v1919_v61 = vmul.f32 %v1012_v40, %v990_v47  ;;  %v1018_v39 = vpop.eup %1017 }
  0x98   :  { %v2287_v38 = vrot.slane %v2281_v30, 6  ;;  %v995_v8 = vadd.f32 -1.0, %v751_v16  ;;  %v1923_v19 = vmul.f32 %v1014_v56, %v991_v15  ;;  %v840_v32 = vrot.slane %v1913_v3, 7  ;;  %v1020_v26 = vpop.eup %1019 }
  0x99   :  { %v756_v48 = vadd.f32 %v2285_v55, %v692_v17  ;;  %v757_v20 = vadd.f32 %v2286_v52, %v699_v28  ;;  %v2288_v27 = vrot.slane %v2281_v30, 7  ;;  %v996_v17 = vadd.f32 -1.0, %v752_v57  ;;  %v1022_v63 = vpop.eup %1021 }
  0x9a   :  { %v758_v23 = vadd.f32 %v2287_v38, %v706_v44  ;;  %v1928_v0 = vmul.f32 %v1016_v7, %v992_v43  ;;  %v843_v28 = vrot.slane %v1919_v61, 6  ;;  %v997_v53 = vadd.f32 -1.0, %v753_v59  ;;  %v1024_v57 = vpop.eup %1023 }
  0x9b   :  { %v759_v58 = vadd.f32 %v2288_v27, %v713_v60  ;;  %v1931_v25 = vmul.f32 %v1018_v39, %v993_v29  ;;  %v842_v44 = vsel %vm2094_vm15, %v840_v32, %v1911_v45  ;;  %v846_v12 = vrot.slane %v1923_v19, 5  ;;  %v1026_v18 = vpop.eup %1025 }
  0x9c   :  { %v998_v37 = vadd.f32 -1.0, %v754_v46  ;;  %v1936_v54 = vmul.f32 %v1020_v26, %v994_v34  ;;  %v845_v42 = vsel %vm2093_vm6, %v843_v28, %v842_v44  ;;  %v849_v16 = vrot.slane %v1928_v0, 4  ;;  %v1028_v4 = vpop.eup %1027 }
  0x9d   :  { %v999_v47 = vadd.f32 -1.0, %v755_v21  ;;  %v1940_v2 = vmul.f32 %v1022_v63, %v995_v8  ;;  %v848_v11 = vsel %vm2092_vm12, %v846_v12, %v845_v42  ;;  %v852_v59 = vrot.slane %v1931_v25, 3 }
  0x9e   :  { %v1000_v15 = vadd.f32 -1.0, %v756_v48  ;;  %v1001_v36 = vadd.f32 -1.0, %v757_v20  ;;  %v851_v60 = vsel %vm2091_vm9, %v849_v16, %v848_v11  ;;  %v855_v46 = vrot.slane %v1936_v54, 2  ;;  %v1030_v56 = vpop.eup %1029 }
  0x9f   :  { %v1946_v43 = vmul.f32 %v1024_v57, %v996_v17  ;;  %v1948_v40 = vmul.f32 %v1026_v18, %v997_v53  ;;  %v854_v21 = vsel %vm2090_vm7, %v852_v59, %v851_v60  ;;  %v858_v29 = vrot.slane %v1940_v2, 1  ;;  %v1032_v20 = vpop.eup %1031 }
  0xa0   :  { %v1002_v55 = vadd.f32 -1.0, %v758_v23  ;;  %v1952_v52 = vmul.f32 %v1028_v4, %v998_v37  ;;  %v857_v48 = vsel %vm2089_vm8, %v855_v46, %v854_v21  ;;  %vm2088_vm5 = vcmask 1047559   ;;  %v1034_v8 = vpop.eup %1033 }
  0xa1   :  { %v1003_v34 = vadd.f32 -1.0, %v759_v58  ;;  %v815_v7 = vmul.f32 %v1030_v56, %v999_v47  ;;  %v861_v38 = vrot.slane %v1948_v40, 7  ;;  %v817_v32 = vmul.f32 %v1032_v20, %v1000_v15 }
  0xa2   :  { %v863_v39 = vrot.slane %v1952_v52, 6  ;;  %v1036_v27 = vpop.eup %1035  ;;  %v819_v17 = vmul.f32 %v1034_v8, %v1001_v36  ;;  %v860_v28 = vsel %vm2088_vm5, %v858_v29, %v857_v48  ;;  %v2289_v15 = vmov 0.0  }
  0xa3   :  { %v862_v23 = vsel %vm2094_vm15, %v861_v38, %v1946_v43  ;;  %v865_v26 = vrot.slane %v815_v7, 5  ;;  %v1038_v53 = vpop.eup %1037  ;;  %v821_v44 = vmul.f32 %v1036_v27, %v1002_v55  ;;  %v867_v58 = vrot.slane %v817_v32, 4 }
  0xa4   :  { %v864_v12 = vsel %vm2093_vm6, %v863_v39, %v862_v23  ;;  %v823_v63 = vmul.f32 %v1038_v53, %v1003_v34  ;;  %v869_v42 = vrot.slane %v819_v17, 3  ;;  %vm877_vm3 = vcmp.gt.f32.partialorder %v1059_v14, %v860_v28 }
  0xa5   :  { %v866_v37 = vsel %vm2092_vm12, %v865_v26, %v864_v12  ;;  %v871_v57 = vrot.slane %v821_v44, 2  ;;  %v879_v36 = vsel %vm877_vm3, 1.0, %v2289_v15 }
  0xa6   :  { %v868_v16 = vsel %vm2091_vm9, %v867_v58, %v866_v37  ;;  %v873_v11 = vrot.slane %v823_v63, 1 }
  0xa7   :  { %v870_v47 = vsel %vm2090_vm7, %v869_v42, %v868_v16 }
  0xa8   :  { %v872_v59 = vsel %vm2089_vm8, %v871_v57, %v870_v47 }
  0xa9   :  { %v874_v18 = vsel %vm2088_vm5, %v873_v11, %v872_v59 }
  0xaa   :  { %vm878_vm4 = vcmp.gt.f32.partialorder %v2281_v30, %v874_v18 }
  0xab   :  { %v880_v60 = vsel %vm878_vm4, 1.0, %v2289_v15  ;;  %v2304_v15 = vld [vmem:[#allocation3_spill] sm:$0xff] }
  0xac   :  { %v881_v46 = vadd.f32 %v880_v60, %v879_v36 }
  0xae   :  { %v882_v4 = vrot.slane %v881_v46, 4 }
  0xb0   :  { %v883_v21 = vadd.f32 %v882_v4, %v881_v46 }
  0xb2   :  { %v884_v29 = vrot.slane %v883_v21, 2 }
  0xb4   :  { %v885_v56 = vadd.f32 %v884_v29, %v883_v21 }
  0xb6   :  { %v886_v55 = vrot.slane %v885_v56, 1 }
  0xb8   :  { %v887_v48 = vadd.f32 %v886_v55, %v885_v56 }
  0xba   :  { %v1004_v20 = vadd.f32 -1.0, %v887_v48 }
  0xbc   :  { %vm889_vm0 = vcmp.eq.f32.partialorder %v1761_v31, %v1004_v20  ;;  %vm890_vm11 = vcmp.eq.f32.partialorder %v1763_v6, %v1004_v20  ;;  %vm891_vm2 = vcmp.eq.f32.partialorder %v1765_v10, %v1004_v20  ;;  %vm892_vm14 = vcmp.eq.f32.partialorder %v1767_v49, %v1004_v20 }
  0xbd   :  { %vm893_vm10 = vcmp.eq.f32.partialorder %v1769_v5, %v1004_v20  ;;  %vm894_vm1 = vcmp.eq.f32.partialorder %v1771_v33, %v1004_v20  ;;  %vm895_vm13 = vcmp.eq.f32.partialorder %v1773_v9, %v1004_v20  ;;  %vm896_vm3 = vcmp.eq.f32.partialorder %v1775_v24, %v1004_v20 }
  0xbe   :  { %vm897_vm4 = vcmp.eq.f32.partialorder %v1777_v41, %v1004_v20  ;;  %vm898_vm5 = vcmp.eq.f32.partialorder %v1779_v50, %v1004_v20  ;;  %vm899_vm8 = vcmp.eq.f32.partialorder %v1781_v51, %v1004_v20  ;;  %vm900_vm7 = vcmp.eq.f32.partialorder %v1786_v35, %v1004_v20 }
  0xbf   :  { %vm901_vm9 = vcmp.eq.f32.partialorder %v1796_v1, %v1004_v20  ;;  %vm902_vm12 = vcmp.eq.f32.partialorder %v1823_v22, %v1004_v20  ;;  %vm903_vm6 = vcmp.eq.f32.partialorder %v1836_v62, %v1004_v20  ;;  %vm904_vm15 = vcmp.eq.f32.partialorder %v1868_v13, %v1004_v20 }
  0xc0   :  { %v905_v34 = vsel %vm889_vm0, %v1911_v45, 0.0  ;;  %v906_v38 = vsel %vm890_vm11, %v1913_v3, 0.0  ;;  %v907_v8 = vsel %vm891_vm2, %v1919_v61, 0.0  ;;  %v908_v39 = vsel %vm892_vm14, %v1923_v19, 0.0 }
  0xc1   :  { %v909_v27 = vsel %vm893_vm10, %v1928_v0, 0.0  ;;  %v910_v31 = vsel %vm894_vm1, %v1931_v25, 0.0  ;;  %v911_v6 = vsel %vm895_vm13, %v1936_v54, 0.0  ;;  %v912_v10 = vsel %vm896_vm3, %v1940_v2, 0.0 }
  0xc2   :  { %v913_v49 = vsel %vm897_vm4, %v1946_v43, 0.0  ;;  %v914_v5 = vsel %vm898_vm5, %v1948_v40, 0.0  ;;  %v915_v33 = vsel %vm899_vm8, %v1952_v52, 0.0  ;;  %v916_v9 = vsel %vm900_vm7, %v815_v7, 0.0 }
  0xc3   :  { %v917_v45 = vsel %vm901_vm9, %v817_v32, 0.0  ;;  %v918_v24 = vsel %vm902_vm12, %v819_v17, 0.0  ;;  %v919_v41 = vsel %vm903_vm6, %v821_v44, 0.0  ;;  %v937_v3 = vrot.slane %v906_v38, 7 }
  0xc4   :  { %v939_v61 = vrot.slane %v907_v8, 6  ;;  %v941_v50 = vrot.slane %v908_v39, 5  ;;  %v920_v19 = vsel %vm904_vm15, %v823_v63, 0.0  ;;  %v943_v51 = vrot.slane %v909_v27, 4 }
  0xc5   :  { %v945_v0 = vrot.slane %v910_v31, 3  ;;  %v951_v25 = vrot.slane %v914_v5, 7  ;;  %vm2290_vm8 = vcmask 1041409   ;;  %v953_v54 = vrot.slane %v915_v33, 6 }
  0xc6   :  { %v938_v35 = vsel %vm2290_vm8, %v937_v3, %v905_v34  ;;  %v955_v1 = vrot.slane %v916_v9, 5  ;;  %v957_v2 = vrot.slane %v917_v45, 4  ;;  %vm2291_vm9 = vcmask 1042434   ;;  %vm2292_vm12 = vmmov %vm2290_vm8 }
  0xc7   :  { %v940_v22 = vsel %vm2291_vm9, %v939_v61, %v938_v35  ;;  %v947_v43 = vrot.slane %v911_v6, 2  ;;  %v952_v62 = vsel %vm2292_vm12, %v951_v25, %v913_v49  ;;  %v959_v40 = vrot.slane %v918_v24, 3  ;;  %vm2294_vm7 = vmmov %vm2291_vm9 }
  0xc8   :  { %vm2293_vm6 = vcmask 1043459   ;;  %v949_v7 = vrot.slane %v912_v10, 1  ;;  %v954_v13 = vsel %vm2294_vm7, %v953_v54, %v952_v62  ;;  %v961_v32 = vrot.slane %v919_v41, 2 }
  0xc9   :  { %v942_v52 = vsel %vm2293_vm6, %v941_v50, %v940_v22  ;;  %vm2295_vm15 = vcmask 1044484   ;;  %vm2296_vm5 = vmmov %vm2293_vm6  ;;  %v963_v23 = vrot.slane %v920_v19, 1  ;;  %vm2297_vm0 = vcmask 1045509  }
  0xca   :  { %v944_v17 = vsel %vm2295_vm15, %v943_v51, %v942_v52  ;;  %v956_v28 = vsel %vm2296_vm5, %v955_v1, %v954_v13  ;;  %vm2298_vm11 = vmmov %vm2295_vm15  ;;  %vm2299_vm2 = vcmask 1046534   ;;  %vm2301_vm10 = vcmask 1047559  }
  0xcb   :  { %v946_v26 = vsel %vm2297_vm0, %v945_v0, %v944_v17  ;;  %v958_v53 = vsel %vm2298_vm11, %v957_v2, %v956_v28  ;;  %vm2300_vm14 = vmmov %vm2297_vm0 }
  0xcc   :  { %v948_v44 = vsel %vm2299_vm2, %v947_v43, %v946_v26  ;;  %v960_v12 = vsel %vm2300_vm14, %v959_v40, %v958_v53  ;;  %vm2302_vm1 = vmmov %vm2299_vm2 }
  0xcd   :  { %v950_v58 = vsel %vm2301_vm10, %v949_v7, %v948_v44  ;;  %v962_v63 = vsel %vm2302_vm1, %v961_v32, %v960_v12  ;;  %vm2303_vm13 = vmmov %vm2301_vm10 }
  0xce   :  { %v964_v37 = vsel %vm2303_vm13, %v963_v23, %v962_v63 }
  0xcf   :  { %v967_v42 = vadd.f32 %v964_v37, %v950_v58 }
  0xd1   :  { %v968_v16 = vrot.slane %v967_v42, 4 }
  0xd3   :  { %v969_v57 = vadd.f32 %v968_v16, %v967_v42 }
  0xd5   :  { %v970_v47 = vrot.slane %v969_v57, 2 }
  0xd7   :  { %v971_v11 = vadd.f32 %v970_v47, %v969_v57 }
  0xd9   :  { %v972_v59 = vrot.slane %v971_v11, 1 }
  0xdb   :  { %v973_v18 = vadd.f32 %v972_v59, %v971_v11 }
  0xdd   :  { %v977_v36 = vrot.slane %v973_v18, %v2304_v15 }
  0xdf   :  { %v978_v60 = vsub.f32 %v1059_v14, %v977_v36  ;;  %v979_v46 = vsub.f32 %v2281_v30, %v977_v36 }
  0xe1   :  { %v980_v4 = vmax.f32 %v978_v60, 0.0  ;;  %v981_v21 = vmax.f32 %v979_v46, 0.0 }
  0xe3   :  { %982 = vst [vmem:[%s2053_s1] sm:$0xff] %v980_v4  ;;  %983 = vst [vmem:[%s2053_s1 + $0x8] sm:$0xff] %v981_v21 }

</bundles_post_ra>
